<compile_context>
chip_gen: v7x
topology: tpu7x:2x2x1
jax: 0.10.0
libtpu: 0.0.40
codegen_flags: <defaults>
</compile_context>

<pallas_src>
import jax
import jax.numpy as jnp
from jax.experimental import pallas as pl
from jax.experimental.pallas import tpu as pltpu

H1 = 400          # encoder_1 / decoder_2 width (fixed by the module)
H2 = 300          # encoder_2 / decoder_1 width (fixed by the module)
VAT_NOISE = 0.005


def _state_option_kernel(x_all_ref,
                         we1_ref, be1_ref, we2_ref, be2_ref, we3_ref, be3_ref,
                         wd1_ref, bd1_ref, wd2_ref, bd2_ref, wd3_ref, bd3_ref,
                         enc_all_ref, dec_ref):
    x_all = x_all_ref[...]                                   # (2B, D) f32
    B = x_all.shape[0] // 2

    # ---------------- encoder: one fused pass over [x ; x_noise] ----------
    h = jnp.dot(x_all.astype(jnp.bfloat16), we1_ref[...],
                preferred_element_type=jnp.float32) + be1_ref[...]      # (2B, H1)
    h = jnp.maximum(h, 0.0)
    h = jnp.dot(h.astype(jnp.bfloat16), we2_ref[...],
                preferred_element_type=jnp.float32) + be2_ref[...]      # (2B, H2)
    h = jnp.maximum(h, 0.0)
    enc_all = jnp.dot(h.astype(jnp.bfloat16), we3_ref[...],
                      preferred_element_type=jnp.float32) + be3_ref[...]  # (2B, opt)
    enc_all_ref[...] = enc_all

    # ---------------- decoder: only on the clean (first B) half -----------
    enc = enc_all[:B]                                                    # (B, opt)
    d = jnp.dot(enc.astype(jnp.bfloat16), wd1_ref[...],
                preferred_element_type=jnp.float32) + bd1_ref[...]       # (B, H2)
    d = jnp.maximum(d, 0.0)
    d = jnp.dot(d.astype(jnp.bfloat16), wd2_ref[...],
                preferred_element_type=jnp.float32) + bd2_ref[...]       # (B, H1)
    d = jnp.maximum(d, 0.0)
    dec = jnp.dot(d.astype(jnp.bfloat16), wd3_ref[...],
                  preferred_element_type=jnp.float32) + bd3_ref[...]     # (B, D)
    dec_ref[...] = dec


def state_option_forward(x, params, noise_key):
    """x: (B, state_dim).  Returns the module's 5-tuple:
       (x, decoded_x, output_option, output_option_noise, encoded_option)."""
    (we1, be1, we2, be2, we3, be3, wd1, bd1, wd2, bd2, wd3, bd3) = params
    x = x.astype(jnp.float32)
    B, D = x.shape
    option_num = we3.shape[1]

    # add_randn(x, 0.005): x + vat_noise * randn * |x|   (deterministic key)
    eps = jax.random.normal(noise_key, x.shape, jnp.float32)
    x_noise = x + VAT_NOISE * eps * jnp.abs(x)
    x_all = jnp.concatenate([x, x_noise], axis=0)                        # (2B, D)

    bf16 = lambda w: w.astype(jnp.bfloat16)
    vmem = pl.BlockSpec(memory_space=pltpu.MemorySpace.VMEM)

    enc_all, decoded_x = pl.pallas_call(
        _state_option_kernel,
        out_shape=(
            jax.ShapeDtypeStruct((2 * B, option_num), jnp.float32),
            jax.ShapeDtypeStruct((B, D), jnp.float32),
        ),
        in_specs=[vmem] * 13,
        out_specs=(vmem, vmem),
    )(x_all,
      bf16(we1), be1, bf16(we2), be2, bf16(we3), be3,
      bf16(wd1), bd1, bf16(wd2), bd2, bf16(wd3), bd3)

    encoded_option = enc_all[:B]
    encoded_option_noise = enc_all[B:]
    # Tiny lane reductions (softmax over option_num) are free in XLA; keeping
    # them outside avoids narrow in-kernel reductions / masked stores.
    output_option = jax.nn.softmax(encoded_option, axis=-1)
    output_option_noise = jax.nn.softmax(encoded_option_noise, axis=-1)
    return x, decoded_x, output_option, output_option_noise, encoded_option


def init_params(key, state_dim, option_num):
    """PyTorch nn.Linear default init (uniform +/- 1/sqrt(fan_in)),
       weights stored as (in, out)."""
    ks = jax.random.split(key, 12)

    def unif(k, shape, fan_in):
        bound = 1.0 / jnp.sqrt(jnp.float32(fan_in))
        return jax.random.uniform(k, shape, jnp.float32, -bound, bound)

    we1 = unif(ks[0], (state_dim, H1), state_dim)
    be1 = unif(ks[1], (1, H1), state_dim)
    we2 = unif(ks[2], (H1, H2), H1)
    be2 = unif(ks[3], (1, H2), H1)
    we3 = unif(ks[4], (H2, option_num), H2)
    be3 = unif(ks[5], (1, option_num), H2)
    wd1 = unif(ks[6], (option_num, H2), option_num)
    bd1 = unif(ks[7], (1, H2), option_num)
    wd2 = unif(ks[8], (H2, H1), H2)
    bd2 = unif(ks[9], (1, H1), H2)
    wd3 = unif(ks[10], (H1, state_dim), H1)
    bd3 = unif(ks[11], (1, state_dim), H1)
    return (we1, be1, we2, be2, we3, be3, wd1, bd1, wd2, bd2, wd3, bd3)


def _reference(x, params, noise_key):
    """Pure-JAX reference mirroring the kernel's bf16 matmul / f32 accum."""
    (we1, be1, we2, be2, we3, be3, wd1, bd1, wd2, bd2, wd3, bd3) = params
    x = x.astype(jnp.float32)

    def lin(a, w, b):
        return jnp.dot(a.astype(jnp.bfloat16), w.astype(jnp.bfloat16),
                       preferred_element_type=jnp.float32) + b

    def encode(a):
        h = jnp.maximum(lin(a, we1, be1), 0.0)
        h = jnp.maximum(lin(h, we2, be2), 0.0)
        return lin(h, we3, be3)

    def decode(a):
        h = jnp.maximum(lin(a, wd1, bd1), 0.0)
        h = jnp.maximum(lin(h, wd2, bd2), 0.0)
        return lin(h, wd3, bd3)

    eps = jax.random.normal(noise_key, x.shape, jnp.float32)
    x_noise = x + VAT_NOISE * eps * jnp.abs(x)

    enc = encode(x)
    enc_noise = encode(x_noise)
    dec = decode(enc)
    return (x, dec, jax.nn.softmax(enc, -1), jax.nn.softmax(enc_noise, -1), enc)


if __name__ == "__main__":
    state_dim, option_num = 12, 3
    batch = 4

    key = jax.random.PRNGKey(0)
    kx, kp, kn = jax.random.split(key, 3)
    x = jax.random.normal(kx, (batch, state_dim), jnp.float32)
    params = init_params(kp, state_dim, option_num)

    fwd = jax.jit(state_option_forward)
    outs = jax.block_until_ready(fwd(x, params, kn))
    refs = _reference(x, params, kn)

    names = ("x", "decoded_x", "output_option", "output_option_noise",
             "encoded_option")
    for name, o, r in zip(names, outs, refs):
        assert o.shape == r.shape, (name, o.shape, r.shape)
        assert jnp.allclose(o, r, atol=5e-3, rtol=5e-3), name

    print("KERNEL_OK")
</pallas_src>

<mosaic_0001>
module attributes {stable_mosaic.version = 11 : i64} {
  func.func @_state_option_kernel(%arg0: memref<8x12xf32, #tpu.memory_space<vmem>>, %arg1: memref<12x400xbf16, #tpu.memory_space<vmem>>, %arg2: memref<1x400xf32, #tpu.memory_space<vmem>>, %arg3: memref<400x300xbf16, #tpu.memory_space<vmem>>, %arg4: memref<1x300xf32, #tpu.memory_space<vmem>>, %arg5: memref<300x3xbf16, #tpu.memory_space<vmem>>, %arg6: memref<1x3xf32, #tpu.memory_space<vmem>>, %arg7: memref<3x300xbf16, #tpu.memory_space<vmem>>, %arg8: memref<1x300xf32, #tpu.memory_space<vmem>>, %arg9: memref<300x400xbf16, #tpu.memory_space<vmem>>, %arg10: memref<1x400xf32, #tpu.memory_space<vmem>>, %arg11: memref<400x12xbf16, #tpu.memory_space<vmem>>, %arg12: memref<1x12xf32, #tpu.memory_space<vmem>>, %arg13: memref<8x3xf32, #tpu.memory_space<vmem>>, %arg14: memref<4x12xf32, #tpu.memory_space<vmem>>) attributes {dimension_semantics = [], scalar_prefetch = 0 : i64, scratch_operands = 0 : i64, tpu.core_type = #tpu.core_type<tc>} {
    %c0 = arith.constant 0 : index
    %c0_0 = arith.constant 0 : index
    %0 = vector.load %arg0[%c0, %c0_0] : memref<8x12xf32, #tpu.memory_space<vmem>>, vector<8x12xf32>
    %1 = arith.truncf %0 : vector<8x12xf32> to vector<8x12xbf16>
    %c0_1 = arith.constant 0 : index
    %c0_2 = arith.constant 0 : index
    %2 = vector.load %arg1[%c0_1, %c0_2] : memref<12x400xbf16, #tpu.memory_space<vmem>>, vector<12x400xbf16>
    %cst = arith.constant dense<0.000000e+00> : vector<8x400xf32>
    %3 = tpu.matmul %1, %2, %cst {dimension_numbers = #tpu.dot_dimension_numbers<[1], [0], [0], [1], [0, 0, 1, 1], [], []>} : vector<8x12xbf16>, vector<12x400xbf16>, vector<8x400xf32> -> vector<8x400xf32>
    %c0_3 = arith.constant 0 : index
    %c0_4 = arith.constant 0 : index
    %4 = vector.load %arg2[%c0_3, %c0_4] : memref<1x400xf32, #tpu.memory_space<vmem>>, vector<1x400xf32>
    %5 = vector.broadcast %4 : vector<1x400xf32> to vector<8x400xf32>
    %6 = arith.addf %3, %5 : vector<8x400xf32>
    %cst_5 = arith.constant 0.000000e+00 : f32
    %7 = vector.broadcast %cst_5 : f32 to vector<8x400xf32>
    %8 = arith.maximumf %6, %7 : vector<8x400xf32>
    %9 = arith.truncf %8 : vector<8x400xf32> to vector<8x400xbf16>
    %c0_6 = arith.constant 0 : index
    %c0_7 = arith.constant 0 : index
    %10 = vector.load %arg3[%c0_6, %c0_7] : memref<400x300xbf16, #tpu.memory_space<vmem>>, vector<400x300xbf16>
    %cst_8 = arith.constant dense<0.000000e+00> : vector<8x300xf32>
    %11 = tpu.matmul %9, %10, %cst_8 {dimension_numbers = #tpu.dot_dimension_numbers<[1], [0], [0], [1], [0, 0, 1, 1], [], []>} : vector<8x400xbf16>, vector<400x300xbf16>, vector<8x300xf32> -> vector<8x300xf32>
    %c0_9 = arith.constant 0 : index
    %c0_10 = arith.constant 0 : index
    %12 = vector.load %arg4[%c0_9, %c0_10] : memref<1x300xf32, #tpu.memory_space<vmem>>, vector<1x300xf32>
    %13 = vector.broadcast %12 : vector<1x300xf32> to vector<8x300xf32>
    %14 = arith.addf %11, %13 : vector<8x300xf32>
    %cst_11 = arith.constant 0.000000e+00 : f32
    %15 = vector.broadcast %cst_11 : f32 to vector<8x300xf32>
    %16 = arith.maximumf %14, %15 : vector<8x300xf32>
    %17 = arith.truncf %16 : vector<8x300xf32> to vector<8x300xbf16>
    %c0_12 = arith.constant 0 : index
    %c0_13 = arith.constant 0 : index
    %18 = vector.load %arg5[%c0_12, %c0_13] : memref<300x3xbf16, #tpu.memory_space<vmem>>, vector<300x3xbf16>
    %cst_14 = arith.constant dense<0.000000e+00> : vector<8x3xf32>
    %19 = tpu.matmul %17, %18, %cst_14 {dimension_numbers = #tpu.dot_dimension_numbers<[1], [0], [0], [1], [0, 0, 1, 1], [], []>} : vector<8x300xbf16>, vector<300x3xbf16>, vector<8x3xf32> -> vector<8x3xf32>
    %c0_15 = arith.constant 0 : index
    %c0_16 = arith.constant 0 : index
    %20 = vector.load %arg6[%c0_15, %c0_16] : memref<1x3xf32, #tpu.memory_space<vmem>>, vector<1x3xf32>
    %21 = vector.broadcast %20 : vector<1x3xf32> to vector<8x3xf32>
    %22 = arith.addf %19, %21 : vector<8x3xf32>
    %c0_17 = arith.constant 0 : index
    %c0_18 = arith.constant 0 : index
    %23 = vector.load %arg13[%c0_17, %c0_18] : memref<8x3xf32, #tpu.memory_space<vmem>>, vector<8x3xf32>
    tpu.vector_store %arg13[%c0_17, %c0_18], %22 {strides = array<i32>} : memref<8x3xf32, #tpu.memory_space<vmem>>, vector<8x3xf32>,
    %24 = vector.extract_strided_slice %22 {offsets = [0, 0], sizes = [4, 3], strides = [1, 1]} : vector<8x3xf32> to vector<4x3xf32>
    %25 = arith.truncf %24 : vector<4x3xf32> to vector<4x3xbf16>
    %c0_19 = arith.constant 0 : index
    %c0_20 = arith.constant 0 : index
    %26 = vector.load %arg7[%c0_19, %c0_20] : memref<3x300xbf16, #tpu.memory_space<vmem>>, vector<3x300xbf16>
    %cst_21 = arith.constant dense<0.000000e+00> : vector<4x300xf32>
    %27 = tpu.matmul %25, %26, %cst_21 {dimension_numbers = #tpu.dot_dimension_numbers<[1], [0], [0], [1], [0, 0, 1, 1], [], []>} : vector<4x3xbf16>, vector<3x300xbf16>, vector<4x300xf32> -> vector<4x300xf32>
    %c0_22 = arith.constant 0 : index
    %c0_23 = arith.constant 0 : index
    %28 = vector.load %arg8[%c0_22, %c0_23] : memref<1x300xf32, #tpu.memory_space<vmem>>, vector<1x300xf32>
    %29 = vector.broadcast %28 : vector<1x300xf32> to vector<4x300xf32>
    %30 = arith.addf %27, %29 : vector<4x300xf32>
    %cst_24 = arith.constant 0.000000e+00 : f32
    %31 = vector.broadcast %cst_24 : f32 to vector<4x300xf32>
    %32 = arith.maximumf %30, %31 : vector<4x300xf32>
    %33 = arith.truncf %32 : vector<4x300xf32> to vector<4x300xbf16>
    %c0_25 = arith.constant 0 : index
    %c0_26 = arith.constant 0 : index
    %34 = vector.load %arg9[%c0_25, %c0_26] : memref<300x400xbf16, #tpu.memory_space<vmem>>, vector<300x400xbf16>
    %cst_27 = arith.constant dense<0.000000e+00> : vector<4x400xf32>
    %35 = tpu.matmul %33, %34, %cst_27 {dimension_numbers = #tpu.dot_dimension_numbers<[1], [0], [0], [1], [0, 0, 1, 1], [], []>} : vector<4x300xbf16>, vector<300x400xbf16>, vector<4x400xf32> -> vector<4x400xf32>
    %c0_28 = arith.constant 0 : index
    %c0_29 = arith.constant 0 : index
    %36 = vector.load %arg10[%c0_28, %c0_29] : memref<1x400xf32, #tpu.memory_space<vmem>>, vector<1x400xf32>
    %37 = vector.broadcast %36 : vector<1x400xf32> to vector<4x400xf32>
    %38 = arith.addf %35, %37 : vector<4x400xf32>
    %cst_30 = arith.constant 0.000000e+00 : f32
    %39 = vector.broadcast %cst_30 : f32 to vector<4x400xf32>
    %40 = arith.maximumf %38, %39 : vector<4x400xf32>
    %41 = arith.truncf %40 : vector<4x400xf32> to vector<4x400xbf16>
    %c0_31 = arith.constant 0 : index
    %c0_32 = arith.constant 0 : index
    %42 = vector.load %arg11[%c0_31, %c0_32] : memref<400x12xbf16, #tpu.memory_space<vmem>>, vector<400x12xbf16>
    %cst_33 = arith.constant dense<0.000000e+00> : vector<4x12xf32>
    %43 = tpu.matmul %41, %42, %cst_33 {dimension_numbers = #tpu.dot_dimension_numbers<[1], [0], [0], [1], [0, 0, 1, 1], [], []>} : vector<4x400xbf16>, vector<400x12xbf16>, vector<4x12xf32> -> vector<4x12xf32>
    %c0_34 = arith.constant 0 : index
    %c0_35 = arith.constant 0 : index
    %44 = vector.load %arg12[%c0_34, %c0_35] : memref<1x12xf32, #tpu.memory_space<vmem>>, vector<1x12xf32>
    %45 = vector.broadcast %44 : vector<1x12xf32> to vector<4x12xf32>
    %46 = arith.addf %43, %45 : vector<4x12xf32>
    %c0_36 = arith.constant 0 : index
    %c0_37 = arith.constant 0 : index
    %47 = vector.load %arg14[%c0_36, %c0_37] : memref<4x12xf32, #tpu.memory_space<vmem>>, vector<4x12xf32>
    tpu.vector_store %arg14[%c0_36, %c0_37], %46 {strides = array<i32>} : memref<4x12xf32, #tpu.memory_space<vmem>>, vector<4x12xf32>,
    return
  }
}

</mosaic_0001>

<bundles_post_ra>
// kernel: state_option_forward.1
= control target key start
LH: loop header
LB: loop body
LE: loop exit
PB: predicated region body
PF: predicated region fallthrough
CT: control target
= control target key end

     0   :  { %vm96_vm0 = vcmask 1045504   ;;  %v2861_v3 = vmov 0   ;;  %vm92_vm1 = vcmask 97280   ;;  %s3673_s0 = inlined_call_operand.vmem [shape: f32[8,12], index: 0, kind: input, shape index: {}]   ;;  %s3674_s1 = inlined_call_operand.vmem [shape: bf16[12,400], index: 1, kind: input, shape index: {}]   ;;  %s3675_s2 = inlined_call_operand.vmem [shape: f32[1,400], index: 2, kind: input, shape index: {}]   ;;  %s3676_s3 = inlined_call_operand.vmem [shape: bf16[400,300], index: 3, kind: input, shape index: {}]   ;;  %s3677_s4 = inlined_call_operand.vmem [shape: f32[1,300], index: 4, kind: input, shape index: {}]   ;;  %s3678_s5 = inlined_call_operand.vmem [shape: bf16[300,3], index: 5, kind: input, shape index: {}]   ;;  %s3679_s6 = inlined_call_operand.vmem [shape: f32[1,3], index: 6, kind: input, shape index: {}]   ;;  %s3680_s7 = inlined_call_operand.vmem [shape: bf16[3,300], index: 7, kind: input, shape index: {}]   ;;  %s3681_s8 = inlined_call_operand.vmem [shape: f32[1,300], index: 8, kind: input, shape index: {}]   ;;  %s3682_s9 = inlined_call_operand.vmem [shape: bf16[300,400], index: 9, kind: input, shape index: {}]   ;;  %s3683_s10 = inlined_call_operand.vmem [shape: f32[1,400], index: 10, kind: input, shape index: {}]   ;;  %s3684_s11 = inlined_call_operand.vmem [shape: bf16[400,12], index: 11, kind: input, shape index: {}]   ;;  %s3685_s12 = inlined_call_operand.vmem [shape: f32[1,12], index: 12, kind: input, shape index: {}]   ;;  %s3686_s13 = inlined_call_operand.vmem [shape: f32[8,3], index: 13, kind: output, shape index: {0}]   ;;  %s3687_s14 = inlined_call_operand.hbm [shape: f32[4,12], index: 14, kind: output, shape index: {1}]  }
   0x1   :  { %v2572_v0 = vld [vmem:[%s3674_s1 + $0x4] ss:$16 sps:$4 sm:$0x3f]   ;;  %v2574_v1 = vld [vmem:[%s3674_s1] ss:$16 sps:$4 sm:$0x3f]   ;;  %141 = vmatprep.mubr.bf16.mxu0 %v2861_v3  ;;  %182 = vmatprep.mubr.bf16.mxu1 %v2861_v3 }
   0x2   :  { %v48_v2 = vld [vmem:[%s3673_s0] sm:$0xff]  ;;  %2249 = vmatprep.subr.msk.bf16.mxu0 %vm96_vm0, %v2572_v0  ;;  %v98_v4 = vsel %vm96_vm0, %v2574_v1, 0  ;;  %v2575_v6 = vld [vmem:[%s3674_s1 + $0xc] ss:$16 sps:$4 sm:$0x3f]  }
   0x3   :  { %v49_v5 = vpack.c.bf16 %v48_v2, %v48_v2  ;;  %110 = vmatpush1.bf16.msra.mxu0 %v98_v4  ;;  %v2577_v7 = vld [vmem:[%s3674_s1 + $0x8] ss:$16 sps:$4 sm:$0x3f]   ;;  %2251 = vmatprep.subr.msk.bf16.mxu1 %vm96_vm0, %v2575_v6  ;;  %v2578_v8 = vld [vmem:[%s3676_s3] ss:$12 sps:$4 sm:$0xff]  }
   0x4   :  { %v2580_v9 = vld [vmem:[%s3676_s3 + $0x4] ss:$12 sps:$4 sm:$0xff]   ;;  %v104_v10 = vsel %vm96_vm0, %v2577_v7, 0  ;;  %v2583_v11 = vld [vmem:[%s3676_s3 + $0x1c] ss:$12 sps:$4 sm:$0xff]  }
   0x5   :  { %151 = vmatpush1.bf16.msra.mxu1 %v104_v10  ;;  %720 = vmatprep.subr.bf16.mxu0 %v2580_v9  ;;  %v2581_v12 = vld [vmem:[%s3676_s3 + $0x18] ss:$12 sps:$4 sm:$0xff]   ;;  %v2586_v13 = vld [vmem:[%s3676_s3 + $0x34] ss:$12 sps:$4 sm:$0xff]   ;;  %v2584_v14 = vld [vmem:[%s3676_s3 + $0x30] ss:$12 sps:$4 sm:$0xff]  }
   0x6   :  { %2250 = vmatmul.mubr.msk.bf16.vlgmr.msra.gmra.mrb[0].mxu0 %vm92_vm1, %v49_v5  ;;  %v2589_v15 = vld [vmem:[%s3676_s3 + $0x4c] ss:$12 sps:$4 sm:$0xff]   ;;  %v2587_v16 = vld [vmem:[%s3676_s3 + $0x48] ss:$12 sps:$4 sm:$0xff]   ;;  %v2592_v19 = vld [vmem:[%s3676_s3 + $0x64] ss:$12 sps:$4 sm:$0xff]  }
   0x7   :  { %721 = vmatpush1.bf16.msra.mxu0 %v2578_v8  ;;  %v2605_v17 = vld [vmem:[%s3676_s3 + $0xc8] ss:$12 sps:$4 sm:$0xff]   ;;  %v2610_v20 = vld [vmem:[%s3676_s3 + $0xe0] ss:$12 sps:$4 sm:$0xff]   ;;  %v2615_v24 = vld [vmem:[%s3676_s3 + $0xf8] ss:$12 sps:$4 sm:$0xff]  }
   0x8   :  { %2252 = vmatmul.mubr.msk.bf16.vlgmr.msra.gmra.mrb[0].mxu1 %vm92_vm1, %v49_v5  ;;  %722 = vmatprep.subr.bf16.mxu0 %v2583_v11  ;;  %v2606_v18 = vld [vmem:[%s3676_s3 + $0x8] ss:$12 sps:$4 sm:$0xff]   ;;  %v2611_v21 = vld [vmem:[%s3676_s3 + $0x20] ss:$12 sps:$4 sm:$0xff]   ;;  %v2616_v25 = vld [vmem:[%s3676_s3 + $0x38] ss:$12 sps:$4 sm:$0xff]  }
   0x9   :  { %2460 = vmatprep.subr.bf16.mxu1 %v2605_v17  ;;  %v2590_v22 = vld [vmem:[%s3676_s3 + $0x60] ss:$12 sps:$4 sm:$0xff]   ;;  %v2595_v23 = vld [vmem:[%s3676_s3 + $0x7c] ss:$12 sps:$4 sm:$0xff]   ;;  %v2593_v26 = vld [vmem:[%s3676_s3 + $0x78] ss:$12 sps:$4 sm:$0xff]  }
   0xa   :  { %2461 = vmatpush3.bf16.msra.mxu1 %v2606_v18  ;;  %v2598_v27 = vld [vmem:[%s3676_s3 + $0x94] ss:$12 sps:$4 sm:$0xff]   ;;  %v2620_v28 = vld [vmem:[%s3676_s3 + $0x110] ss:$12 sps:$4 sm:$0xff]   ;;  %v2601_v32 = vld [vmem:[%s3676_s3 + $0xac] ss:$12 sps:$4 sm:$0xff]  }
   0xb   :  { %723 = vmatpush1.bf16.msra.mxu0 %v2581_v12  ;;  %2462 = vmatprep.subr.bf16.mxu1 %v2610_v20  ;;  %v2621_v29 = vld [vmem:[%s3676_s3 + $0x50] ss:$12 sps:$4 sm:$0xff]   ;;  %v2625_v31 = vld [vmem:[%s3676_s3 + $0x128] ss:$12 sps:$4 sm:$0xff]   ;;  %v2630_v35 = vld [vmem:[%s3676_s3 + $0x140] ss:$12 sps:$4 sm:$0xff]  }
   0xc   :  { %724 = vmatprep.subr.bf16.mxu0 %v2586_v13  ;;  %v2596_v30 = vld [vmem:[%s3676_s3 + $0x90] ss:$12 sps:$4 sm:$0xff]   ;;  %v2599_v33 = vld [vmem:[%s3676_s3 + $0xa8] ss:$12 sps:$4 sm:$0xff]   ;;  %v2631_v37 = vld [vmem:[%s3676_s3 + $0x80] ss:$12 sps:$4 sm:$0xff]  }
   0xd   :  { %v2626_v34 = vld [vmem:[%s3676_s3 + $0x68] ss:$12 sps:$4 sm:$0xff]   ;;  %v2604_v36 = vld [vmem:[%s3676_s3 + $0xc4] ss:$12 sps:$4 sm:$0xff]   ;;  %v2602_v38 = vld [vmem:[%s3676_s3 + $0xc0] ss:$12 sps:$4 sm:$0xff]  }
   0xe   :  { %2463 = vmatpush3.bf16.msra.mxu1 %v2611_v21  ;;  %v2609_v39 = vld [vmem:[%s3676_s3 + $0xdc] ss:$12 sps:$4 sm:$0xff]   ;;  %v2607_v40 = vld [vmem:[%s3676_s3 + $0xd8] ss:$12 sps:$4 sm:$0xff]   ;;  %v2614_v41 = vld [vmem:[%s3676_s3 + $0xf4] ss:$12 sps:$4 sm:$0xff]  }
   0xf   :  { %725 = vmatpush1.bf16.msra.mxu0 %v2584_v14  ;;  %2464 = vmatprep.subr.bf16.mxu1 %v2615_v24  ;;  %v2612_v42 = vld [vmem:[%s3676_s3 + $0xf0] ss:$12 sps:$4 sm:$0xff]   ;;  %v2619_v43 = vld [vmem:[%s3676_s3 + $0x10c] ss:$12 sps:$4 sm:$0xff]   ;;  %v2617_v44 = vld [vmem:[%s3676_s3 + $0x108] ss:$12 sps:$4 sm:$0xff]  }
  0x10   :  { %726 = vmatprep.subr.bf16.mxu0 %v2589_v15  ;;  %v2624_v45 = vld [vmem:[%s3676_s3 + $0x124] ss:$12 sps:$4 sm:$0xff]   ;;  %v2622_v46 = vld [vmem:[%s3676_s3 + $0x120] ss:$12 sps:$4 sm:$0xff]   ;;  %v2629_v47 = vld [vmem:[%s3676_s3 + $0x13c] ss:$12 sps:$4 sm:$0xff]  }
  0x11   :  { %v2627_v48 = vld [vmem:[%s3676_s3 + $0x138] ss:$12 sps:$4 sm:$0xff]   ;;  %v2634_v49 = vld [vmem:[%s3676_s3 + $0x154] ss:$12 sps:$4 sm:$0xff]   ;;  %v2632_v51 = vld [vmem:[%s3676_s3 + $0x150] ss:$12 sps:$4 sm:$0xff]  }
  0x12   :  { %2465 = vmatpush3.bf16.msra.mxu1 %v2616_v25  ;;  %v2635_v50 = vld [vmem:[%s3676_s3 + $0x158] ss:$12 sps:$4 sm:$0xff]   ;;  %v2640_v54 = vld [vmem:[%s3676_s3 + $0x170] ss:$12 sps:$4 sm:$0xff]   ;;  %v2637_v55 = vld [vmem:[%s3676_s3 + $0x168] ss:$12 sps:$4 sm:$0xff]  }
  0x13   :  { %727 = vmatpush1.bf16.msra.mxu0 %v2587_v16  ;;  %2466 = vmatprep.subr.bf16.mxu1 %v2620_v28  ;;  %v2636_v52 = vld [vmem:[%s3676_s3 + $0x98] ss:$12 sps:$4 sm:$0xff]   ;;  %v2641_v56 = vld [vmem:[%s3676_s3 + $0xb0] ss:$12 sps:$4 sm:$0xff]  }
  0x14   :  { %728 = vmatprep.subr.bf16.mxu0 %v2592_v19  ;;  %v2639_v53 = vld [vmem:[%s3676_s3 + $0x16c] ss:$12 sps:$4 sm:$0xff]   ;;  %v2644_v57 = vld [vmem:[%s3676_s3 + $0x184] ss:$12 sps:$4 sm:$0xff]  }
  0x16   :  { %2467 = vmatpush3.bf16.msra.mxu1 %v2621_v29 }
  0x17   :  { %729 = vmatpush1.bf16.msra.mxu0 %v2590_v22  ;;  %2468 = vmatprep.subr.bf16.mxu1 %v2625_v31 }
  0x18   :  { %730 = vmatprep.subr.bf16.mxu0 %v2595_v23 }
  0x1a   :  { %2469 = vmatpush3.bf16.msra.mxu1 %v2626_v34 }
  0x1b   :  { %731 = vmatpush1.bf16.msra.mxu0 %v2593_v26  ;;  %2470 = vmatprep.subr.bf16.mxu1 %v2630_v35 }
  0x1c   :  { %732 = vmatprep.subr.bf16.mxu0 %v2598_v27 }
  0x1e   :  { %2471 = vmatpush3.bf16.msra.mxu1 %v2631_v37 }
  0x1f   :  { %733 = vmatpush1.bf16.msra.mxu0 %v2596_v30  ;;  %2472 = vmatprep.subr.bf16.mxu1 %v2635_v50 }
  0x20   :  { %734 = vmatprep.subr.bf16.mxu0 %v2601_v32 }
  0x22   :  { %2473 = vmatpush3.bf16.msra.mxu1 %v2636_v52 }
  0x23   :  { %735 = vmatpush1.bf16.msra.mxu0 %v2599_v33  ;;  %2474 = vmatprep.subr.bf16.mxu1 %v2640_v54 }
  0x24   :  { %736 = vmatprep.subr.bf16.mxu0 %v2604_v36 }
  0x26   :  { %2475 = vmatpush3.bf16.msra.mxu1 %v2641_v56 }
  0x27   :  { %737 = vmatpush1.bf16.msra.mxu0 %v2602_v38  ;;  %842 = vmatprep.subr.bf16.mxu1 %v2861_v3 }
  0x28   :  { %738 = vmatprep.subr.bf16.mxu0 %v2609_v39 }
  0x2b   :  { %739 = vmatpush1.bf16.msra.mxu0 %v2607_v40 }
  0x2c   :  { %740 = vmatprep.subr.bf16.mxu0 %v2614_v41 }
  0x2f   :  { %741 = vmatpush1.bf16.msra.mxu0 %v2612_v42 }
  0x30   :  { %742 = vmatprep.subr.bf16.mxu0 %v2619_v43 }
  0x33   :  { %743 = vmatpush1.bf16.msra.mxu0 %v2617_v44 }
  0x34   :  { %744 = vmatprep.subr.bf16.mxu0 %v2624_v45 }
  0x37   :  { %745 = vmatpush1.bf16.msra.mxu0 %v2622_v46 }
  0x38   :  { %746 = vmatprep.subr.bf16.mxu0 %v2629_v47 }
  0x3b   :  { %747 = vmatpush1.bf16.msra.mxu0 %v2627_v48 }
  0x3c   :  { %748 = vmatprep.subr.bf16.mxu0 %v2634_v49 }
  0x3f   :  { %749 = vmatpush1.bf16.msra.mxu0 %v2632_v51 }
  0x40   :  { %750 = vmatprep.subr.bf16.mxu0 %v2639_v53 }
  0x43   :  { %751 = vmatpush1.bf16.msra.mxu0 %v2637_v55 }
  0x44   :  { %761 = vmatprep.subr.bf16.mxu0 %v2644_v57 }
  0x45   :  { %20 = vsyncpa [#allocation3], 0  ;;  %v56_v58 = vlaneseq  ;;  %v3119_v61 = vld [vmem:[%s3675_s2] sm:$0xf]  ;;  %v2645_v18 = vld [vmem:[%s3676_s3 + $0x188] ss:$12 sps:$4 sm:$0xff]  }
  0x46   :  { %v2642_v17 = vld [vmem:[%s3676_s3 + $0x180] ss:$12 sps:$4 sm:$0xff]   ;;  %v2648_v21 = vld [vmem:[%s3676_s3 + $0x19c] ss:$12 sps:$4 sm:$0xff]   ;;  %vm716_vm2 = vcmask 130048   ;;  %v2862_v55 = vmov 0.0  }
  0x47   :  { %v3111_v59 = vshrl.u32 %v56_v58, 7  ;;  %v2646_v24 = vld [vmem:[%s3676_s3 + $0x198] ss:$12 sps:$4 sm:$0xff]   ;;  %v2649_v25 = vld [vmem:[%s3676_s3 + $0x1a0] ss:$12 sps:$4 sm:$0xff]   ;;  %v2682_v58 = vld [vmem:[%s3678_s5 + $0x50] sm:$0xff]  }
  0x48   :  { %v2652_v26 = vld [vmem:[%s3676_s3 + $0x1b4] ss:$12 sps:$4 sm:$0xff]   ;;  %v2650_v27 = vld [vmem:[%s3676_s3 + $0x1b0] ss:$12 sps:$4 sm:$0xff]   ;;  %v2653_v28 = vld [vmem:[%s3676_s3 + $0x1b8] ss:$12 sps:$4 sm:$0xff]  }
  0x49   :  { %v3114_v60 = vsub.s32 0, %v3111_v59  ;;  %v3122_v62 = vsub.s32 1, %v3111_v59  ;;  %v70_v0 = vsub.s32 3, %v3111_v59  ;;  %v2656_v29 = vld [vmem:[%s3676_s3 + $0x1cc] ss:$12 sps:$4 sm:$0xff]   ;;  %v3193_v38 = vsub.s32 2, %v3111_v59 }
  0x4a   :  { %v2654_v30 = vld [vmem:[%s3676_s3 + $0x1c8] ss:$12 sps:$4 sm:$0xff]   ;;  %v2657_v31 = vld [vmem:[%s3676_s3 + $0x1d0] ss:$12 sps:$4 sm:$0xff]   ;;  %v2658_v33 = vld [vmem:[%s3676_s3 + $0x1e0] ss:$12 sps:$4 sm:$0xff]  }
  0x4b   :  { %v59_v63 = vrot.slane %v3119_v61, %v3114_v60  ;;  %v63_v1 = vrot.slane %v3119_v61, %v3122_v62  ;;  %v71_v6 = vrot.slane %v3119_v61, %v70_v0  ;;  %v2660_v32 = vld [vmem:[%s3676_s3 + $0x1e4] ss:$12 sps:$4 sm:$0xff]   ;;  %v2661_v34 = vld [vmem:[%s3676_s3 + $0x1e8] ss:$12 sps:$4 sm:$0xff]   ;;  %v2665_v37 = vld [vmem:[%s3676_s3 + $0x200] ss:$12 sps:$4 sm:$0xff]   ;;  %v67_v42 = vrot.slane %v3119_v61, %v3193_v38 }
  0x4c   :  { %v2664_v35 = vld [vmem:[%s3676_s3 + $0x1fc] ss:$12 sps:$4 sm:$0xff]   ;;  %v2662_v36 = vld [vmem:[%s3676_s3 + $0x1f8] ss:$12 sps:$4 sm:$0xff]   ;;  %v2668_v39 = vld [vmem:[%s3676_s3 + $0x214] ss:$12 sps:$4 sm:$0xff]  }
  0x4d   :  { %v2666_v40 = vld [vmem:[%s3676_s3 + $0x210] ss:$12 sps:$4 sm:$0xff]   ;;  %v2669_v41 = vld [vmem:[%s3676_s3 + $0x218] ss:$12 sps:$4 sm:$0xff]   ;;  %v2670_v44 = vld [vmem:[%s3676_s3 + $0x228] ss:$12 sps:$4 sm:$0xff]  }
  0x4e   :  { %v2672_v43 = vld [vmem:[%s3676_s3 + $0x22c] ss:$12 sps:$4 sm:$0xff]   ;;  %v2673_v45 = vld [vmem:[%s3676_s3 + $0x230] ss:$12 sps:$4 sm:$0xff]   ;;  %v2677_v49 = vld [vmem:[%s3676_s3 + $0x248] ss:$12 sps:$4 sm:$0xff]  }
  0x4f   :  { %v2676_v47 = vld [vmem:[%s3676_s3 + $0x244] ss:$12 sps:$4 sm:$0xff]   ;;  %v2674_v48 = vld [vmem:[%s3676_s3 + $0x240] ss:$12 sps:$4 sm:$0xff]   ;;  %vm2863_vm3 = vmmov 0   ;;  %vm1046_vm4 = vcmask 359424  }
  0x50   :  { %v2678_v52 = vld [vmem:[%s3678_s5 + $0x40] sm:$0xff]   ;;  %v2680_v54 = vld [vmem:[%s3678_s5 + $0x48] sm:$0xff]   ;;  %v2683_v61 = vld [vmem:[%s3678_s5 + $0x10] sm:$0xff]   ;;  %vm1174_vm5 = vcmask 1040384   ;;  %vm1175_vm6 = vcmask 1041408   ;;  %vm1133_vm7 = vcmask 23552  }
  0x51   :  { %v2679_v53 = vld [vmem:[%s3678_s5] sm:$0xff]   ;;  %v2681_v56 = vld [vmem:[%s3678_s5 + $0x8] sm:$0xff]   ;;  %s2866_s16 = smov [#allocation2]   ;;  %vm2225_vm8 = vcmask 93184  }
  0x52   :  { %v2688_v57 = vld [vmem:[%s3678_s5 + $0x80] sm:$0xff]   ;;  %s2235_s17 = sshll.u32 %s2866_s16, 4  ;;  %s2236_s17 = int_to_ptr.vmem [resolvable:$true] %s2235_s17 }
  0x53   :  { %s2837_s18 = scalar_lea.vmem %s2236_s17, 64  ;;  %p2842_p1 = scmp.lt.s32.totalorder %s2236_s17, %s2236_s17 }
  0x54   :  { %p2838_p0 = scmp.ne.s32.totalorder %s2236_s17, %s2837_s18  ;;  %p2843_p2 = scmp.lt.s32.totalorder %s2837_s18, %s2837_s18 }
  0x56   :  { %p2844_p3 = por %p2843_p2, %p2842_p1 }
  0x58   :  { %p2845_p4 = pnand %p2844_p3, %p2838_p0 }
  0xd9   :  { %v143_v2 = vpop.f32.mrb[0].mxu0 }
  0xda   :  { %v144_v4 = vadd.f32 %v143_v2, %v59_v63  ;;  %v145_v5 = vpop.f32.mrb[1].mxu0  ;;  %v2684_v63 = vld [vmem:[%s3678_s5 + $0x58] sm:$0xff]   ;;  %v2686_v2 = vld [vmem:[%s3678_s5 + $0x60] sm:$0xff]  }
  0xdb   :  { %v146_v7 = vadd.f32 %v145_v5, %v63_v1  ;;  %v147_v8 = vpop.f32.mrb[2].mxu0  ;;  %v3132_v11 = vpop.f32.mrb[0].mxu1  ;;  %v2685_v1 = vld [vmem:[%s3678_s5 + $0x18] sm:$0xff]   ;;  %v2689_v5 = vld [vmem:[%s3678_s5 + $0x68] sm:$0xff]  }
  0xdc   :  { %v191_v9 = vmax.f32 %v144_v4, 0.0  ;;  %v148_v10 = vpop.f32.mrb[3].mxu0  ;;  %v186_v13 = vpop.f32.mrb[1].mxu1  ;;  %v185_v46 = vadd.f32 %v3132_v11, %v67_v42  ;;  %v2687_v4 = vld [vmem:[%s3678_s5 + $0x20] sm:$0xff]   ;;  %v2692_v8 = vld [vmem:[%s3678_s5 + $0x70] sm:$0xff]  }
  0xdd   :  { %v192_v12 = vmax.f32 %v146_v7, 0.0  ;;  %v187_v14 = vadd.f32 %v186_v13, %v71_v6  ;;  %v188_v15 = vpop.f32.mrb[2].mxu1  ;;  %v2690_v6 = vld [vmem:[%s3678_s5 + $0x28] sm:$0xff]   ;;  %v2694_v10 = vld [vmem:[%s3678_s5 + $0x90] sm:$0x3f]   ;;  %v2696_v13 = vld [vmem:[%s3678_s5 + $0x38] sm:$0xff]  }
  0xde   :  { %v189_v19 = vpop.f32.mrb[3].mxu1  ;;  %v195_v20 = vpack.c.bf16 %v191_v9, %v191_v9  ;;  %v193_v50 = vmax.f32 %v185_v46, 0.0  ;;  %v2691_v7 = vld [vmem:[%s3678_s5 + $0x88] sm:$0xff]   ;;  %v2693_v9 = vld [vmem:[%s3678_s5 + $0x30] sm:$0xff]   ;;  %v1051_v11 = vsel %vm96_vm0, %v2694_v10, 0 }
  0xdf   :  { %v196_v16 = vpack.c.bf16 %v192_v12, %v192_v12  ;;  %v194_v22 = vmax.f32 %v187_v14, 0.0  ;;  %v2695_v12 = vld [vmem:[%s3678_s5 + $0x78] sm:$0xff]   ;;  %v299_v19 = vld [vmem:[%s3677_s4] sm:$0x7]  ;;  %v2864_v42 = vmov 1983009808  }
  0xe0   :  { %v197_v51 = vpack.c.bf16 %v193_v50, %v193_v50  ;;  %v1136_v46 = vld [vmem:[%s3680_s7] sm:$0x3f] }
  0xe1   :  { %752 = vmatprep.mubr.bf16.mxu0 %v196_v16  ;;  %834 = vmatprep.mubr.bf16.mxu1 %v196_v16  ;;  %v198_v23 = vpack.c.bf16 %v194_v22, %v194_v22  ;;  %v308_v22 = vrot.slane %v299_v19, %v3122_v62  ;;  %v2728_v10 = vld [vmem:[%s3682_s9 + $0xa0] ss:$16 sps:$4 sm:$0xff]  }
  0xe2   :  { %753 = vmatmul.mubr.bf16.vlgmr.msra.gmra.mrb[4].mxu0 %v195_v20  ;;  %835 = vmatmul.mubr.bf16.vlgmr.msra.gmra.mrb[4].mxu1 %v195_v20  ;;  %v312_v20 = vrot.slane %v299_v19, %v3193_v38 }
  0xe3   :  { %762 = vmatpush1.bf16.msra.mxu0 %v2642_v17  ;;  %843 = vmatpush1.bf16.msra.mxu1 %v2645_v18 }
  0xe4   :  { %763 = vmatprep.subr.bf16.mxu0 %v2648_v21  ;;  %844 = vmatprep.subr.bf16.mxu1 %v2861_v3  ;;  %v304_v21 = vrot.slane %v299_v19, %v3114_v60  ;;  %v2760_v19 = vld [vmem:[%s3682_s9 + $0x144] ss:$16 sps:$4 sm:$0xff]  }
  0xe5   :  { %2328 = vmatprep.mubr.msk.bf16.mxu0 %vm716_vm2, %v198_v23  ;;  %2329 = vmatprep.mubr.msk.bf16.mxu1 %vm716_vm2, %v198_v23 }
  0xe7   :  { %764 = vmatpush1.bf16.msra.mxu0 %v2646_v24  ;;  %845 = vmatpush1.bf16.msra.mxu1 %v2649_v25 }
  0xe8   :  { %765 = vmatprep.subr.bf16.mxu0 %v2652_v26  ;;  %846 = vmatprep.subr.bf16.mxu1 %v2861_v3 }
  0xeb   :  { %766 = vmatpush1.bf16.msra.mxu0 %v2650_v27  ;;  %847 = vmatpush1.bf16.msra.mxu1 %v2653_v28 }
  0xec   :  { %767 = vmatprep.subr.bf16.mxu0 %v2656_v29  ;;  %848 = vmatprep.subr.bf16.mxu1 %v2861_v3 }
  0xef   :  { %768 = vmatpush1.bf16.msra.mxu0 %v2654_v30  ;;  %849 = vmatpush1.bf16.msra.mxu1 %v2657_v31 }
  0xf0   :  { %769 = vmatprep.subr.bf16.mxu0 %v2660_v32  ;;  %850 = vmatprep.subr.bf16.mxu1 %v2861_v3 }
  0xf3   :  { %770 = vmatpush1.bf16.msra.mxu0 %v2658_v33  ;;  %851 = vmatpush1.bf16.msra.mxu1 %v2661_v34 }
  0xf4   :  { %771 = vmatprep.subr.bf16.mxu0 %v2664_v35  ;;  %852 = vmatprep.subr.bf16.mxu1 %v2861_v3 }
  0xf7   :  { %772 = vmatpush1.bf16.msra.mxu0 %v2662_v36  ;;  %853 = vmatpush1.bf16.msra.mxu1 %v2665_v37 }
  0xf8   :  { %773 = vmatprep.subr.bf16.mxu0 %v2668_v39  ;;  %854 = vmatprep.subr.bf16.mxu1 %v2861_v3 }
  0xfb   :  { %774 = vmatpush1.bf16.msra.mxu0 %v2666_v40  ;;  %855 = vmatpush1.bf16.msra.mxu1 %v2669_v41 }
  0xfc   :  { %775 = vmatprep.subr.bf16.mxu0 %v2672_v43  ;;  %856 = vmatprep.subr.bf16.mxu1 %v2861_v3  ;;  %v1157_v43 = vunpack.c.l.s4 %v2864_v42  ;;  %v2701_v42 = vld [vmem:[%s3682_s9 + $0x8] ss:$16 sps:$4 sm:$0xff]  }
  0xff   :  { %776 = vmatpush1.bf16.msra.mxu0 %v2670_v44  ;;  %857 = vmatpush1.bf16.msra.mxu1 %v2673_v45  ;;  %v1158_v44 = vunpack.c.0.s8 %v1157_v43  ;;  %v2709_v43 = vld [vmem:[%s3682_s9 + $0x2c] ss:$16 sps:$4 sm:$0xff]  }
 0x100   :  { %777 = vmatprep.subr.bf16.mxu0 %v2676_v47  ;;  %858 = vmatprep.subr.bf16.mxu1 %v2861_v3 }
 0x101   :  { %v1161_v45 = vsub.s32 %v1158_v44, %v3111_v59  ;;  %v2707_v44 = vld [vmem:[%s3682_s9 + $0x28] ss:$16 sps:$4 sm:$0xff]  }
 0x103   :  { %778 = vmatpush1.bf16.msra.mxu0 %v2674_v48  ;;  %859 = vmatpush1.bf16.msra.mxu1 %v2677_v49  ;;  %v1162_v47 = vrot.slane %v1136_v46, %v1161_v45  ;;  %v2865_v49 = vmov 65535  }
 0x104   :  { %2532 = vmatprep.subr.bf16.mxu0 %v2862_v55  ;;  %2482 = vmatprep.subr.bf16.mxu1 %v2678_v52  ;;  %v1176_v50 = vsel %vm1174_vm5, 4294967295, %v2865_v49  ;;  %v2725_v49 = vld [vmem:[%s3682_s9 + $0x88] ss:$16 sps:$4 sm:$0xff]  }
 0x105   :  { %v1170_v48 = vcombine.high %v1162_v47, %v1162_v47 }
 0x106   :  { %794 = vmatmul.mubr.bf16.vlgmr.msra.gmra.mrb[4].mxu0 %v197_v51  ;;  %875 = vmatmul.mubr.bf16.vlgmr.msra.gmra.mrb[8].mxu1 %v197_v51  ;;  %v3303_v51 = vsel %vm1175_vm6, %v1176_v50, 0  ;;  %v2733_v50 = vld [vmem:[%s3682_s9 + $0xac] ss:$16 sps:$4 sm:$0xff]  }
 0x107   :  { %2483 = vmatpush3.bf16.msra.mxu1 %v2679_v53  ;;  %2533 = vmatpush3.bf16.msra.mxu0 %v2688_v57  ;;  %v1182_v52 = vand.u32 %v3303_v51, %v1170_v48  ;;  %v1179_v53 = vand.u32 %v3303_v51, %v1162_v47  ;;  %v2719_v47 = vld [vmem:[%s3682_s9 + $0x68] ss:$16 sps:$4 sm:$0xff]   ;;  %v2727_v48 = vld [vmem:[%s3682_s9 + $0x8c] ss:$16 sps:$4 sm:$0xff]  }
 0x108   :  { %2484 = vmatprep.subr.bf16.mxu1 %v2680_v54  ;;  %2534 = vmatprep.subr.bf16.mxu0 %v2862_v55  ;;  %v1155_v54 = vcombine.high %v1136_v46, %v1136_v46  ;;  %v2721_v46 = vld [vmem:[%s3682_s9 + $0x6c] ss:$16 sps:$4 sm:$0xff]  }
 0x109   :  { %2538 = vmatprep.mubr.msk.bf16.mxu0 %vm2863_vm3, %v2862_v55 }
 0x10b   :  { %2485 = vmatpush3.bf16.msra.mxu1 %v2681_v56  ;;  %2535 = vmatpush3.bf16.msra.mxu0 %v2691_v7  ;;  %v3308_v56 = vrot.slane %v1155_v54, %v1161_v45  ;;  %v2724_v7 = vld [vmem:[%s3682_s9 + $0x84] ss:$16 sps:$4 sm:$0xff]   ;;  %v2713_v45 = vld [vmem:[%s3682_s9 + $0x48] ss:$16 sps:$4 sm:$0xff]   ;;  %v2745_v54 = vld [vmem:[%s3682_s9 + $0xec] ss:$16 sps:$4 sm:$0xff]  }
 0x10c   :  { %2486 = vmatprep.subr.bf16.mxu1 %v2682_v58  ;;  %2536 = vmatprep.subr.bf16.mxu0 %v2862_v55  ;;  %v2698_v58 = vld [vmem:[%s3682_s9] ss:$16 sps:$4 sm:$0xff]  }
 0x10d   :  { %v1185_v57 = vand.u32 %v3303_v51, %v3308_v56  ;;  %v2731_v51 = vld [vmem:[%s3682_s9 + $0xa8] ss:$16 sps:$4 sm:$0xff]  }
 0x10e   :  { %v2743_v56 = vld [vmem:[%s3682_s9 + $0xe8] ss:$16 sps:$4 sm:$0xff]  }
 0x10f   :  { %2487 = vmatpush3.bf16.msra.mxu1 %v2683_v61  ;;  %2537 = vmatpush3.bf16.msra.mxu0 %v1051_v11  ;;  %v2700_v61 = vld [vmem:[%s3682_s9 + $0x4] ss:$16 sps:$4 sm:$0xff]  }
 0x110   :  { %2488 = vmatprep.subr.bf16.mxu1 %v2684_v63  ;;  %v2706_v63 = vld [vmem:[%s3682_s9 + $0x24] ss:$16 sps:$4 sm:$0xff]   ;;  %1763 = vmatprep.subr.bf16.mxu0 %v2700_v61  ;;  %v2757_v61 = vld [vmem:[%s3682_s9 + $0x12c] ss:$16 sps:$4 sm:$0xff]  }
 0x111   :  { %v2736_v11 = vld [vmem:[%s3682_s9 + $0xc4] ss:$16 sps:$4 sm:$0xff]  }
 0x113   :  { %2489 = vmatpush3.bf16.msra.mxu1 %v2685_v1  ;;  %v2704_v1 = vld [vmem:[%s3682_s9 + $0x20] ss:$16 sps:$4 sm:$0xff]  }
 0x114   :  { %2490 = vmatprep.subr.bf16.mxu1 %v2686_v2  ;;  %v2712_v2 = vld [vmem:[%s3682_s9 + $0x44] ss:$16 sps:$4 sm:$0xff]  }
 0x117   :  { %2491 = vmatpush3.bf16.msra.mxu1 %v2687_v4  ;;  %v2710_v4 = vld [vmem:[%s3682_s9 + $0x40] ss:$16 sps:$4 sm:$0xff]  }
 0x118   :  { %2492 = vmatprep.subr.bf16.mxu1 %v2689_v5  ;;  %v2718_v5 = vld [vmem:[%s3682_s9 + $0x64] ss:$16 sps:$4 sm:$0xff]  }
 0x11b   :  { %2493 = vmatpush3.bf16.msra.mxu1 %v2690_v6  ;;  %v2716_v6 = vld [vmem:[%s3682_s9 + $0x60] ss:$16 sps:$4 sm:$0xff]  }
 0x11c   :  { %2494 = vmatprep.subr.bf16.mxu1 %v2692_v8  ;;  %v2722_v8 = vld [vmem:[%s3682_s9 + $0x80] ss:$16 sps:$4 sm:$0xff]  }
 0x11f   :  { %2495 = vmatpush3.bf16.msra.mxu1 %v2693_v9  ;;  %v2730_v9 = vld [vmem:[%s3682_s9 + $0xa4] ss:$16 sps:$4 sm:$0xff]  }
 0x120   :  { %2496 = vmatprep.subr.bf16.mxu1 %v2695_v12  ;;  %v2734_v12 = vld [vmem:[%s3682_s9 + $0xc0] ss:$16 sps:$4 sm:$0xff]  }
 0x123   :  { %2497 = vmatpush3.bf16.msra.mxu1 %v2696_v13  ;;  %v2742_v13 = vld [vmem:[%s3682_s9 + $0xe4] ss:$16 sps:$4 sm:$0xff]  }
 0x124   :  { %1187 = vmatprep.subr.bf16.mxu1 %v1182_v52  ;;  %v2739_v52 = vld [vmem:[%s3682_s9 + $0xcc] ss:$16 sps:$4 sm:$0xff]  }
 0x1b5   :  { %v2476_v14 = vpop.f32.mrb[4].mxu1 }
 0x1b6   :  { %v2477_v15 = vpop.f32.mrb[5].mxu1 }
 0x1b7   :  { %v2478_v16 = vadd.f32 %v2477_v15, %v2476_v14  ;;  %v2479_v17 = vpop.f32.mrb[6].mxu1  ;;  %v2740_v14 = vld [vmem:[%s3682_s9 + $0xe0] ss:$16 sps:$4 sm:$0xff]   ;;  %v2748_v15 = vld [vmem:[%s3682_s9 + $0x104] ss:$16 sps:$4 sm:$0xff]  }
 0x1b8   :  { %v2480_v18 = vpop.f32.mrb[7].mxu1  ;;  %v2754_v17 = vld [vmem:[%s3682_s9 + $0x124] ss:$16 sps:$4 sm:$0xff]  }
 0x1b9   :  { %v837_v23 = vadd.f32 %v2478_v16, %v312_v20  ;;  %v2746_v16 = vld [vmem:[%s3682_s9 + $0x100] ss:$16 sps:$4 sm:$0xff]  }
 0x1ba   :  { %v2752_v18 = vld [vmem:[%s3682_s9 + $0x120] ss:$16 sps:$4 sm:$0xff]  }
 0x1bb   :  { %v2758_v20 = vld [vmem:[%s3682_s9 + $0x140] ss:$16 sps:$4 sm:$0xff]  }
 0x1d9   :  { %v795_v24 = vpop.f32.mrb[4].mxu0  ;;  %v876_v25 = vpop.f32.mrb[8].mxu1 }
 0x1da   :  { %v2548_v26 = vadd.f32 %v795_v24, %v304_v21  ;;  %v877_v27 = vadd.f32 %v876_v25, %v837_v23  ;;  %v797_v28 = vpop.f32.mrb[5].mxu0  ;;  %v878_v29 = vpop.f32.mrb[9].mxu1  ;;  %v2766_v21 = vld [vmem:[%s3682_s9 + $0x164] ss:$16 sps:$4 sm:$0xff]   ;;  %v2770_v24 = vld [vmem:[%s3682_s9 + $0x180] ss:$16 sps:$4 sm:$0xff]  }
 0x1db   :  { %v2549_v30 = vadd.f32 %v797_v28, %v308_v22  ;;  %v799_v31 = vpop.f32.mrb[6].mxu0  ;;  %v879_v32 = vpop.f32.mrb[10].mxu1  ;;  %v2764_v22 = vld [vmem:[%s3682_s9 + $0x160] ss:$16 sps:$4 sm:$0xff]   ;;  %v2772_v23 = vld [vmem:[%s3682_s9 + $0x184] ss:$16 sps:$4 sm:$0xff]  }
 0x1dc   :  { %v882_v33 = vmax.f32 %v2548_v26, 0.0  ;;  %v884_v34 = vmax.f32 %v877_v27, 0.0  ;;  %v800_v35 = vpop.f32.mrb[7].mxu0  ;;  %v880_v36 = vpop.f32.mrb[11].mxu1  ;;  %v2778_v25 = vld [vmem:[%s3682_s9 + $0x1a4] ss:$16 sps:$4 sm:$0xff]  }
 0x1dd   :  { %v883_v37 = vmax.f32 %v2549_v30, 0.0  ;;  %v2776_v26 = vld [vmem:[%s3682_s9 + $0x1a0] ss:$16 sps:$4 sm:$0xff]  }
 0x1de   :  { %v887_v39 = vpack.c.bf16 %v884_v34, %v884_v34  ;;  %v885_v41 = vpack.c.bf16 %v882_v33, %v882_v33  ;;  %v2330_v31 = vld [vmem:[%s3679_s6] ss:$0 sm:$0xff] }
 0x1df   :  { %v886_v40 = vpack.c.bf16 %v883_v37, %v883_v37 }
 0x1e0   :  { %2539 = vmatmul.mubr.msk.bf16.vlgmr.msra.gmra.mrb[8].mxu0 %vm1046_vm4, %v887_v39 }
 0x1e1   :  { %1085 = vmatprep.mubr.bf16.mxu1 %v886_v40  ;;  %1764 = vmatpush1.bf16.msra.mxu0 %v2698_v58  ;;  %v2749_v58 = vld [vmem:[%s3682_s9 + $0x108] ss:$16 sps:$4 sm:$0xff]  }
 0x1e2   :  { %1086 = vmatmul.mubr.bf16.vlgmr.msra.gmra.mrb[12].mxu1 %v885_v41  ;;  %1765 = vmatprep.subr.bf16.mxu0 %v2706_v63  ;;  %v2703_v41 = vld [vmem:[%s3682_s9 + $0xc] ss:$16 sps:$4 sm:$0xff]   ;;  %v2755_v63 = vld [vmem:[%s3682_s9 + $0x128] ss:$16 sps:$4 sm:$0xff]  }
 0x1e3   :  { %1219 = vmatprep.mubr.bf16.mxu1 %v2861_v3  ;;  %1188 = vmatpush1.bf16.msra.mxu1 %v1179_v53  ;;  %v2737_v53 = vld [vmem:[%s3682_s9 + $0xc8] ss:$16 sps:$4 sm:$0xff]  }
 0x1e4   :  { %2542 = vmatprep.subr.bf16.mxu1 %v2862_v55 }
 0x1e5   :  { %1766 = vmatpush1.bf16.msra.mxu0 %v2704_v1  ;;  %v2763_v1 = vld [vmem:[%s3682_s9 + $0x14c] ss:$16 sps:$4 sm:$0xff]  }
 0x1e6   :  { %1767 = vmatprep.subr.bf16.mxu0 %v2712_v2  ;;  %v2761_v2 = vld [vmem:[%s3682_s9 + $0x148] ss:$16 sps:$4 sm:$0xff]  }
 0x1e9   :  { %1768 = vmatpush1.bf16.msra.mxu0 %v2710_v4  ;;  %v2769_v4 = vld [vmem:[%s3682_s9 + $0x16c] ss:$16 sps:$4 sm:$0xff]  }
 0x1ea   :  { %1769 = vmatprep.subr.bf16.mxu0 %v2718_v5  ;;  %v2767_v5 = vld [vmem:[%s3682_s9 + $0x168] ss:$16 sps:$4 sm:$0xff]  }
 0x1ed   :  { %1770 = vmatpush1.bf16.msra.mxu0 %v2716_v6  ;;  %v2775_v6 = vld [vmem:[%s3682_s9 + $0x18c] ss:$16 sps:$4 sm:$0xff]  }
 0x1ee   :  { %1771 = vmatprep.subr.bf16.mxu0 %v2724_v7  ;;  %v2773_v7 = vld [vmem:[%s3682_s9 + $0x188] ss:$16 sps:$4 sm:$0xff]  }
 0x1f1   :  { %1772 = vmatpush1.bf16.msra.mxu0 %v2722_v8  ;;  %v2781_v8 = vld [vmem:[%s3682_s9 + $0x1ac] ss:$16 sps:$4 sm:$0xff]  }
 0x1f2   :  { %1773 = vmatprep.subr.bf16.mxu0 %v2730_v9  ;;  %v2779_v9 = vld [vmem:[%s3682_s9 + $0x1a8] ss:$16 sps:$4 sm:$0xff]  }
 0x1f5   :  { %1774 = vmatpush1.bf16.msra.mxu0 %v2728_v10  ;;  %v2784_v10 = vld [vmem:[%s3682_s9 + $0x1c4] ss:$16 sps:$4 sm:$0xff]  }
 0x1f6   :  { %1775 = vmatprep.subr.bf16.mxu0 %v2736_v11  ;;  %v2787_v11 = vld [vmem:[%s3682_s9 + $0x1cc] ss:$16 sps:$4 sm:$0xff]  }
 0x1f9   :  { %1776 = vmatpush1.bf16.msra.mxu0 %v2734_v12  ;;  %v2782_v12 = vld [vmem:[%s3682_s9 + $0x1c0] ss:$16 sps:$4 sm:$0xff]  }
 0x1fa   :  { %1777 = vmatprep.subr.bf16.mxu0 %v2742_v13  ;;  %v2785_v13 = vld [vmem:[%s3682_s9 + $0x1c8] ss:$16 sps:$4 sm:$0xff]  }
 0x1fd   :  { %1778 = vmatpush1.bf16.msra.mxu0 %v2740_v14  ;;  %v2790_v14 = vld [vmem:[%s3682_s9 + $0x1e4] ss:$16 sps:$4 sm:$0xff]  }
 0x1fe   :  { %1779 = vmatprep.subr.bf16.mxu0 %v2748_v15  ;;  %v2793_v15 = vld [vmem:[%s3682_s9 + $0x1ec] ss:$16 sps:$4 sm:$0xff]  }
 0x201   :  { %1780 = vmatpush1.bf16.msra.mxu0 %v2746_v16  ;;  %v2788_v16 = vld [vmem:[%s3682_s9 + $0x1e0] ss:$16 sps:$4 sm:$0xff]  }
 0x202   :  { %1781 = vmatprep.subr.bf16.mxu0 %v2754_v17  ;;  %v2791_v17 = vld [vmem:[%s3682_s9 + $0x1e8] ss:$16 sps:$4 sm:$0xff]  }
 0x205   :  { %1782 = vmatpush1.bf16.msra.mxu0 %v2752_v18  ;;  %v2796_v18 = vld [vmem:[%s3682_s9 + $0x204] ss:$16 sps:$4 sm:$0xff]  }
 0x206   :  { %1783 = vmatprep.subr.bf16.mxu0 %v2760_v19  ;;  %v2799_v19 = vld [vmem:[%s3682_s9 + $0x20c] ss:$16 sps:$4 sm:$0xff]  }
 0x209   :  { %1784 = vmatpush1.bf16.msra.mxu0 %v2758_v20  ;;  %v1137_v20 = vld [vmem:[%s3681_s8] sm:$0x7] }
 0x20a   :  { %1785 = vmatprep.subr.bf16.mxu0 %v2766_v21  ;;  %v1142_v21 = vrot.slane %v1137_v20, %v3114_v60 }
 0x20d   :  { %1786 = vmatpush1.bf16.msra.mxu0 %v2764_v22  ;;  %v1146_v22 = vrot.slane %v1137_v20, %v3122_v62 }
 0x20e   :  { %1787 = vmatprep.subr.bf16.mxu0 %v2772_v23 }
 0x211   :  { %1788 = vmatpush1.bf16.msra.mxu0 %v2770_v24 }
 0x212   :  { %1789 = vmatprep.subr.bf16.mxu0 %v2778_v25 }
 0x215   :  { %1790 = vmatpush1.bf16.msra.mxu0 %v2776_v26 }
 0x216   :  { %1791 = vmatprep.subr.bf16.mxu0 %v2784_v10  ;;  %v2828_v10 = vld [vmem:[%s3684_s11 + $0x68] sm:$0xff]  }
 0x219   :  { %1792 = vmatpush1.bf16.msra.mxu0 %v2782_v12  ;;  %v2829_v12 = vld [vmem:[%s3684_s11 + $0x28] sm:$0xff]  }
 0x21a   :  { %1793 = vmatprep.subr.bf16.mxu0 %v2790_v14  ;;  %v2831_v14 = vld [vmem:[%s3684_s11 + $0x70] sm:$0xff]  }
 0x21d   :  { %1794 = vmatpush1.bf16.msra.mxu0 %v2788_v16  ;;  %v2833_v16 = vld [vmem:[%s3684_s11 + $0xb8] sm:$0xff]  }
 0x21e   :  { %1804 = vmatprep.subr.bf16.mxu0 %v2796_v18  ;;  %v2835_v18 = vld [vmem:[%s3684_s11 + $0x38] sm:$0xff]  }
 0x2b3   :  { %v1127_v27 = vpop.f32.mrb[8].mxu0 }
 0x2b4   :  { %v2540_v28 = vpop.f32.mrb[9].mxu0 }
 0x2b5   :  { %v2498_v29 = vpop.f32.mrb[12].mxu1  ;;  %v1130_v30 = vpop.f32.mrb[10].mxu0 }
 0x2b6   :  { %v2499_v32 = vpop.f32.mrb[13].mxu1  ;;  %v2541_v33 = vpop.f32.mrb[11].mxu0 }
 0x2b7   :  { %v2500_v34 = vadd.f32 %v2499_v32, %v2498_v29  ;;  %v2501_v35 = vpop.f32.mrb[14].mxu1  ;;  %v2794_v32 = vld [vmem:[%s3682_s9 + $0x200] ss:$16 sps:$4 sm:$0xff]   ;;  %v2797_v33 = vld [vmem:[%s3682_s9 + $0x208] ss:$16 sps:$4 sm:$0xff]  }
 0x2b8   :  { %v2502_v36 = vpop.f32.mrb[15].mxu1  ;;  %v1150_v35 = vrot.slane %v1137_v20, %v3193_v38  ;;  %v1350_v20 = vld [vmem:[%s3683_s10] sm:$0xf] }
 0x2b9   :  { %v1088_v37 = vadd.f32 %v2500_v34, %v2330_v31  ;;  %v2802_v36 = vld [vmem:[%s3682_s9 + $0x224] ss:$16 sps:$4 sm:$0xff]  }
 0x2bb   :  { %v1128_v39 = vadd.f32 %v1127_v27, %v1088_v37  ;;  %v2805_v37 = vld [vmem:[%s3682_s9 + $0x22c] ss:$16 sps:$4 sm:$0xff]  }
 0x2bd   :  { %v1135_v40 = vpack.c.bf16 %v1128_v39, %v1128_v39  ;;  %1134 = vst.msk [vmem:[%s3686_s13] sm:$0xff] %vm1133_vm7, %v1128_v39 }
 0x2bf   :  { %2351 = vmatmul.mubr.msk.bf16.vlgmr.msra.gmra.mrb[16].mxu1 %vm1133_vm7, %v1135_v40 }
 0x2c0   :  { %2543 = vmatpush3.bf16.msra.mxu1 %v1185_v57  ;;  %2544 = vmatprep.mubr.msk.bf16.mxu1 %vm2863_vm3, %v2862_v55  ;;  %v2715_v55 = vld [vmem:[%s3682_s9 + $0x4c] ss:$16 sps:$4 sm:$0xff]  }
 0x2c1   :  { %1845 = vmatprep.subr.bf16.mxu1 %v2703_v41  ;;  %v2751_v57 = vld [vmem:[%s3682_s9 + $0x10c] ss:$16 sps:$4 sm:$0xff]   ;;  %v2800_v41 = vld [vmem:[%s3682_s9 + $0x220] ss:$16 sps:$4 sm:$0xff]  }
 0x2c7   :  { %2545 = vmatmul.mubr.msk.bf16.vlgmr.msra.gmra.mrb[20].mxu1 %vm1133_vm7, %v1135_v40 }
 0x2c8   :  { %1846 = vmatpush1.bf16.msra.mxu1 %v2701_v42  ;;  %v2806_v42 = vld [vmem:[%s3682_s9 + $0x244] ss:$16 sps:$4 sm:$0x3f]  }
 0x2c9   :  { %1847 = vmatprep.subr.bf16.mxu1 %v2709_v43  ;;  %v2808_v43 = vld [vmem:[%s3682_s9 + $0x240] ss:$16 sps:$4 sm:$0x3f]  }
 0x2cc   :  { %1848 = vmatpush1.bf16.msra.mxu1 %v2707_v44 }
 0x2cd   :  { %1849 = vmatprep.subr.bf16.mxu1 %v2715_v55  ;;  %v2803_v55 = vld [vmem:[%s3682_s9 + $0x228] ss:$16 sps:$4 sm:$0xff]  }
 0x2d0   :  { %1850 = vmatpush1.bf16.msra.mxu1 %v2713_v45  ;;  %v2809_v45 = vld [vmem:[%s3682_s9 + $0x24c] ss:$16 sps:$4 sm:$0x3f]  }
 0x2d1   :  { %1851 = vmatprep.subr.bf16.mxu1 %v2721_v46 }
 0x2d4   :  { %1852 = vmatpush1.bf16.msra.mxu1 %v2719_v47 }
 0x2d5   :  { %1853 = vmatprep.subr.bf16.mxu1 %v2727_v48  ;;  %v2811_v48 = vld [vmem:[%s3682_s9 + $0x248] ss:$16 sps:$4 sm:$0x3f]  }
 0x2d8   :  { %1854 = vmatpush1.bf16.msra.mxu1 %v2725_v49 }
 0x2d9   :  { %1855 = vmatprep.subr.bf16.mxu1 %v2733_v50  ;;  %v1752_v50 = vsel %vm96_vm0, %v2808_v43, 0 }
 0x2dc   :  { %1856 = vmatpush1.bf16.msra.mxu1 %v2731_v51  ;;  %v1758_v51 = vsel %vm96_vm0, %v2811_v48, 0 }
 0x2dd   :  { %1857 = vmatprep.subr.bf16.mxu1 %v2739_v52  ;;  %v2813_v52 = vld [vmem:[%s3684_s11 + $0x40] sm:$0xff]  }
 0x2e0   :  { %1858 = vmatpush1.bf16.msra.mxu1 %v2737_v53  ;;  %v2812_v53 = vld [vmem:[%s3684_s11 + $0x80] sm:$0xff]  }
 0x2e1   :  { %1859 = vmatprep.subr.bf16.mxu1 %v2745_v54  ;;  %v2814_v54 = vld [vmem:[%s3684_s11] sm:$0xff]  }
 0x2e4   :  { %1860 = vmatpush1.bf16.msra.mxu1 %v2743_v56 }
 0x2e5   :  { %1861 = vmatprep.subr.bf16.mxu1 %v2751_v57  ;;  %v2816_v57 = vld [vmem:[%s3684_s11 + $0x48] sm:$0xff]  }
 0x2e8   :  { %1862 = vmatpush1.bf16.msra.mxu1 %v2749_v58  ;;  %v2815_v58 = vld [vmem:[%s3684_s11 + $0x88] sm:$0xff]  }
 0x2e9   :  { %1863 = vmatprep.subr.bf16.mxu1 %v2757_v61  ;;  %v2817_v61 = vld [vmem:[%s3684_s11 + $0x8] sm:$0xff]  }
 0x2ec   :  { %1864 = vmatpush1.bf16.msra.mxu1 %v2755_v63  ;;  %v2819_v63 = vld [vmem:[%s3684_s11 + $0x50] sm:$0xff]  }
 0x2ed   :  { %1865 = vmatprep.subr.bf16.mxu1 %v2763_v1  ;;  %v2818_v1 = vld [vmem:[%s3684_s11 + $0x90] sm:$0xff]  }
 0x2f0   :  { %1866 = vmatpush1.bf16.msra.mxu1 %v2761_v2  ;;  %v2820_v2 = vld [vmem:[%s3684_s11 + $0x10] sm:$0xff]  }
 0x2f1   :  { %1867 = vmatprep.subr.bf16.mxu1 %v2769_v4  ;;  %v2822_v4 = vld [vmem:[%s3684_s11 + $0x58] sm:$0xff]  }
 0x2f4   :  { %1868 = vmatpush1.bf16.msra.mxu1 %v2767_v5  ;;  %v2821_v5 = vld [vmem:[%s3684_s11 + $0x98] sm:$0xff]  }
 0x2f5   :  { %1869 = vmatprep.subr.bf16.mxu1 %v2775_v6  ;;  %v2823_v6 = vld [vmem:[%s3684_s11 + $0x18] sm:$0xff]  }
 0x2f8   :  { %1870 = vmatpush1.bf16.msra.mxu1 %v2773_v7  ;;  %v2825_v7 = vld [vmem:[%s3684_s11 + $0x60] sm:$0xff]  }
 0x2f9   :  { %1871 = vmatprep.subr.bf16.mxu1 %v2781_v8  ;;  %v2824_v8 = vld [vmem:[%s3684_s11 + $0xa0] sm:$0xff]  }
 0x2fc   :  { %1872 = vmatpush1.bf16.msra.mxu1 %v2779_v9  ;;  %v2826_v9 = vld [vmem:[%s3684_s11 + $0x20] sm:$0xff]  }
 0x2fd   :  { %1873 = vmatprep.subr.bf16.mxu1 %v2787_v11  ;;  %v2827_v11 = vld [vmem:[%s3684_s11 + $0xa8] sm:$0xff]  }
 0x300   :  { %1874 = vmatpush1.bf16.msra.mxu1 %v2785_v13  ;;  %v2830_v13 = vld [vmem:[%s3684_s11 + $0xb0] sm:$0xff]  }
 0x301   :  { %1875 = vmatprep.subr.bf16.mxu1 %v2793_v15  ;;  %v2832_v15 = vld [vmem:[%s3684_s11 + $0x30] sm:$0xff]  }
 0x304   :  { %1876 = vmatpush1.bf16.msra.mxu1 %v2791_v17  ;;  %v2834_v17 = vld [vmem:[%s3684_s11 + $0x78] sm:$0xff]  }
 0x305   :  { %1886 = vmatprep.subr.bf16.mxu1 %v2799_v19  ;;  %v2836_v19 = vld [vmem:[%s3684_s11 + $0xc0] sm:$0xff]  }
 0x392   :  { %v1221_v23 = vpop.f32.mrb[16].mxu1 }
 0x393   :  { %v1222_v24 = vadd.f32 %v1221_v23, %v1142_v21  ;;  %v1223_v25 = vpop.f32.mrb[17].mxu1  ;;  %v1355_v21 = vrot.slane %v1350_v20, %v3114_v60  ;;  %v1367_v23 = vrot.slane %v1350_v20, %v70_v0 }
 0x394   :  { %v1224_v26 = vadd.f32 %v1223_v25, %v1146_v22  ;;  %v1225_v27 = vpop.f32.mrb[18].mxu1  ;;  %v1363_v22 = vrot.slane %v1350_v20, %v3193_v38 }
 0x395   :  { %v1268_v28 = vmax.f32 %v1222_v24, 0.0  ;;  %v1226_v29 = vpop.f32.mrb[19].mxu1 }
 0x396   :  { %v1269_v30 = vmax.f32 %v1224_v26, 0.0 }
 0x397   :  { %v1271_v34 = vpack.c.bf16 %v1268_v28, %v1268_v28 }
 0x398   :  { %v1272_v31 = vpack.c.bf16 %v1269_v30, %v1269_v30 }
 0x39a   :  { %v1262_v39 = vpop.f32.mrb[20].mxu1  ;;  %1795 = vmatprep.mubr.bf16.mxu0 %v1272_v31  ;;  %1877 = vmatprep.mubr.bf16.mxu1 %v1272_v31 }
 0x39b   :  { %v2546_v40 = vpop.f32.mrb[21].mxu1  ;;  %1796 = vmatmul.mubr.bf16.vlgmr.msra.gmra.mrb[12].mxu0 %v1271_v34  ;;  %1878 = vmatmul.mubr.bf16.vlgmr.msra.gmra.mrb[24].mxu1 %v1271_v34  ;;  %v1263_v46 = vadd.f32 %v1262_v39, %v1150_v35 }
 0x39c   :  { %1805 = vmatpush1.bf16.msra.mxu0 %v2794_v32  ;;  %v1265_v44 = vpop.f32.mrb[22].mxu1  ;;  %1887 = vmatpush1.bf16.msra.mxu1 %v2797_v33 }
 0x39d   :  { %v2547_v47 = vpop.f32.mrb[23].mxu1  ;;  %1806 = vmatprep.subr.bf16.mxu0 %v2802_v36  ;;  %1888 = vmatprep.subr.bf16.mxu1 %v2805_v37  ;;  %v1270_v49 = vmax.f32 %v1263_v46, 0.0 }
 0x39e   :  { %1836 = vmatprep.mubr.bf16.mxu0 %v2861_v3  ;;  %1918 = vmatprep.mubr.bf16.mxu1 %v2861_v3 }
 0x39f   :  { %v1273_v56 = vpack.c.bf16 %v1270_v49, %v1270_v49 }
 0x3a0   :  { %1807 = vmatpush1.bf16.msra.mxu0 %v2800_v41  ;;  %1889 = vmatpush1.bf16.msra.mxu1 %v2803_v55 }
 0x3a1   :  { %2429 = vmatprep.subr.msk.bf16.mxu0 %vm96_vm0, %v2806_v42  ;;  %2431 = vmatprep.subr.msk.bf16.mxu1 %vm96_vm0, %v2809_v45  ;;  %v2433_v42 = vld [vmem:[%s3685_s12] ss:$0 sm:$0xff] }
 0x3a4   :  { %1809 = vmatpush1.bf16.msra.mxu0 %v1752_v50  ;;  %1891 = vmatpush1.bf16.msra.mxu1 %v1758_v51 }
 0x3a5   :  { %2185 = vmatprep.subr.bf16.mxu1 %v2861_v3  ;;  %2510 = vmatprep.subr.bf16.mxu0 %v2813_v52 }
 0x3a7   :  { %2430 = vmatmul.mubr.msk.bf16.vlgmr.msra.gmra.mrb[12].mxu0 %vm1046_vm4, %v1273_v56  ;;  %2432 = vmatmul.mubr.msk.bf16.vlgmr.msra.gmra.mrb[24].mxu1 %vm1046_vm4, %v1273_v56 }
 0x3a8   :  { %2186 = vmatpush1.bf16.msra.mxu1 %v2812_v53  ;;  %2511 = vmatpush3.bf16.msra.mxu0 %v2814_v54 }
 0x3a9   :  { %2187 = vmatprep.subr.bf16.mxu1 %v2861_v3  ;;  %2512 = vmatprep.subr.bf16.mxu0 %v2816_v57 }
 0x3ac   :  { %2188 = vmatpush1.bf16.msra.mxu1 %v2815_v58  ;;  %2513 = vmatpush3.bf16.msra.mxu0 %v2817_v61 }
 0x3ad   :  { %2189 = vmatprep.subr.bf16.mxu1 %v2861_v3  ;;  %2514 = vmatprep.subr.bf16.mxu0 %v2819_v63 }
 0x3b0   :  { %2190 = vmatpush1.bf16.msra.mxu1 %v2818_v1  ;;  %2515 = vmatpush3.bf16.msra.mxu0 %v2820_v2 }
 0x3b1   :  { %2191 = vmatprep.subr.bf16.mxu1 %v2861_v3  ;;  %2516 = vmatprep.subr.bf16.mxu0 %v2822_v4 }
 0x3b4   :  { %2192 = vmatpush1.bf16.msra.mxu1 %v2821_v5  ;;  %2517 = vmatpush3.bf16.msra.mxu0 %v2823_v6 }
 0x3b5   :  { %2193 = vmatprep.subr.bf16.mxu1 %v2861_v3  ;;  %2518 = vmatprep.subr.bf16.mxu0 %v2825_v7 }
 0x3b8   :  { %2194 = vmatpush1.bf16.msra.mxu1 %v2824_v8  ;;  %2519 = vmatpush3.bf16.msra.mxu0 %v2826_v9 }
 0x3b9   :  { %2195 = vmatprep.subr.bf16.mxu1 %v2861_v3  ;;  %2520 = vmatprep.subr.bf16.mxu0 %v2828_v10 }
 0x3bc   :  { %2196 = vmatpush1.bf16.msra.mxu1 %v2827_v11  ;;  %2521 = vmatpush3.bf16.msra.mxu0 %v2829_v12 }
 0x3bd   :  { %2197 = vmatprep.subr.bf16.mxu1 %v2861_v3  ;;  %2522 = vmatprep.subr.bf16.mxu0 %v2831_v14 }
 0x3c0   :  { %2198 = vmatpush1.bf16.msra.mxu1 %v2830_v13  ;;  %2523 = vmatpush3.bf16.msra.mxu0 %v2832_v15 }
 0x3c1   :  { %2199 = vmatprep.subr.bf16.mxu1 %v2861_v3  ;;  %2524 = vmatprep.subr.bf16.mxu0 %v2834_v17 }
 0x3c4   :  { %2200 = vmatpush1.bf16.msra.mxu1 %v2833_v16  ;;  %2525 = vmatpush3.bf16.msra.mxu0 %v2835_v18 }
 0x3c5   :  { %2201 = vmatprep.subr.bf16.mxu1 %v2861_v3  ;;  %v1359_v3 = vrot.slane %v1350_v20, %v3122_v62 }
 0x3c8   :  { %2202 = vmatpush1.bf16.msra.mxu1 %v2836_v19 }
 0x47a   :  { %v1838_v24 = vpop.f32.mrb[12].mxu0  ;;  %v1920_v25 = vpop.f32.mrb[24].mxu1 }
 0x47b   :  { %v2550_v26 = vadd.f32 %v1838_v24, %v1355_v21  ;;  %v2552_v27 = vadd.f32 %v1920_v25, %v1363_v22  ;;  %v1840_v28 = vpop.f32.mrb[13].mxu0  ;;  %v1922_v29 = vpop.f32.mrb[25].mxu1 }
 0x47c   :  { %v2551_v30 = vadd.f32 %v1840_v28, %v1359_v3  ;;  %v2553_v31 = vadd.f32 %v1922_v29, %v1367_v23  ;;  %v1842_v32 = vpop.f32.mrb[14].mxu0  ;;  %v1924_v33 = vpop.f32.mrb[26].mxu1 }
 0x47d   :  { %v1927_v34 = vmax.f32 %v2550_v26, 0.0  ;;  %v1929_v35 = vmax.f32 %v2552_v27, 0.0  ;;  %v1843_v60 = vpop.f32.mrb[15].mxu0  ;;  %v1925_v36 = vpop.f32.mrb[27].mxu1 }
 0x47e   :  { %v1928_v38 = vmax.f32 %v2551_v30, 0.0  ;;  %v1930_v37 = vmax.f32 %v2553_v31, 0.0 }
 0x47f   :  { %v1931_v59 = vpack.c.bf16 %v1927_v34, %v1927_v34  ;;  %v1933_v0 = vpack.c.bf16 %v1929_v35, %v1929_v35 }
 0x480   :  { %v1932_v62 = vpack.c.bf16 %v1928_v38, %v1928_v38  ;;  %v1934_v39 = vpack.c.bf16 %v1930_v37, %v1930_v37 }
 0x482   :  { %2177 = vmatprep.mubr.bf16.mxu0 %v1932_v62  ;;  %2459 = vmatprep.mubr.msk.bf16.mxu1 %vm716_vm2, %v1934_v39 }
 0x483   :  { %2178 = vmatmul.mubr.bf16.vlgmr.msra.gmra.mrb[16].mxu0 %v1931_v59  ;;  %2218 = vmatmul.mubr.bf16.vlgmr.msra.gmra.mrb[28].mxu1 %v1933_v0 }
 0x556   :  { %v2526_v40 = vpop.f32.mrb[16].mxu0  ;;  %v2219_v41 = vpop.f32.mrb[28].mxu1 }
 0x557   :  { %v2527_v43 = vpop.f32.mrb[17].mxu0  ;;  %v2221_v44 = vpop.f32.mrb[29].mxu1 }
 0x558   :  { %v2528_v55 = vadd.f32 %v2527_v43, %v2526_v40  ;;  %v2529_v45 = vpop.f32.mrb[18].mxu0  ;;  %v2222_v46 = vpop.f32.mrb[30].mxu1 }
 0x559   :  { %v2530_v47 = vpop.f32.mrb[19].mxu0  ;;  %v2223_v48 = vpop.f32.mrb[31].mxu1 }
 0x55a   :  { %v2180_v49 = vadd.f32 %v2528_v55, %v2433_v42 }
 0x55c   :  { %v2220_v50 = vadd.f32 %v2219_v41, %v2180_v49 }
 0x55e   :  { %2226 = vst.msk [vmem:[#allocation2] sm:$0xf] %vm2225_vm8, %v2220_v50 }
 0x55f   :  { %2848 = shalt.err (!%p2845_p4)
}
 0x560   :  { %s2849_s9 = scalar_lea.hbm %s3687_s14, 64 }
 0x561   :  { %p2850_p5 = scmp.ne.s32.totalorder %s3687_s14, %s2849_s9  ;;  %p2853_p6 = scmp.lt.u32.totalorder %s2849_s9, %s3687_s14 }
 0x563   :  { %p2855_p7 = pnand %p2853_p6, %p2850_p5 }
 0x565   :  { %2858 = shalt.err (!%p2855_p7)
}
 0x566   :  { %2238 = dma.vmem_to_hbm [thread:$0]  %s2236_s17, 64, %s3687_s14, [#allocation3]  }
 0x567   :  { %2859 = dma.done.wait [#allocation3], 64  }
 0x568   :  { %2860 = vsyncadd [#allocation3], 4294967232 }
 0x569   :  { %2244 = vsyncpa [#allocation3], 1 }

</bundles_post_ra>
